<compile_context>
chip_gen: v7x
topology: tpu7x:2x2x1
jax: 0.10.0
libtpu: 0.0.40
codegen_flags: <defaults>
</compile_context>

<pallas_src>
import math
import numpy as np
import jax
import jax.numpy as jnp
from jax import lax
from jax.experimental import pallas as pl
from jax.experimental.pallas import tpu as pltpu


def make_kernel(k):
    k = np.asarray(k, dtype=np.float32)
    if k.ndim == 1:
        k = k[None, :] * k[:, None]
    k = k / k.sum()
    return k


def _phase_taps(k1d_flipped, up, pad0):
    """Per output phase: list of (coef, input_row/col_offset) of the 1-D polyphase filter."""
    K = len(k1d_flipped)
    taps = []
    for phase in range(up):
        row = []
        for t in range(K):
            if (phase + t - pad0) % up == 0:
                row.append((float(k1d_flipped[t]), (phase + t - pad0) // up))
        taps.append(row)
    return taps


def _pick_bg(ncb, img_bytes, target_bytes):
    """Channel-blocks per grid step: biggest divisor of ncb that fits the input budget,
    preferring choices that leave >= 2 grid steps (keeps both v7x TensorCores busy)."""
    divs = [d for d in range(1, ncb + 1) if ncb % d == 0]
    fit = [d for d in divs if d * img_bytes <= target_bytes]
    if not fit:
        return 1
    pref = [d for d in fit if ncb // d >= 2]
    return max(pref) if pref else max(fit)


def upsample_pallas(x, kernel_1d=(1, 3, 3, 1), factor=2):
    N, C, H, W = x.shape
    up = factor
    k1 = np.asarray(kernel_1d, dtype=np.float64)
    assert k1.ndim == 1, "only separable 1-D FIR kernels supported"
    K = k1.shape[0]
    # make_kernel(k) * factor**2 == outer(k1n, k1n) with k1n = k * factor / sum(k)
    k1n = k1 * up / k1.sum()
    p = K - up
    pad0 = (p + 1) // 2 + up - 1
    pad1 = p // 2
    # TODO(synk): negative padding (crop) branch of upfirdn2d not implemented; it cannot
    # occur for the standard [1,3,3,1] / factor=2 configuration.
    assert pad0 >= 0 and pad1 >= 0
    out_h = H * up + pad0 + pad1 - K + 1
    out_w = W * up + pad0 + pad1 - K + 1
    assert out_h == up * H and out_w == up * W  # always true for Upsample's pad formula

    # upfirdn2d flips the kernel before (cross-)correlating -> true convolution.
    kflip = k1n[::-1]
    taps = _phase_taps(kflip, up, pad0)          # identical taps for rows and columns
    n_phase = up * up

    itemsize = jnp.dtype(x.dtype).itemsize
    acc_dtype = jnp.float32                      # keep f32 accumulation for any I/O dtype

    # ---- Lane-dense channel packing:  Bc channels along lanes, LW = lcm(W, 128). ----
    NC = N * C
    Bc = 128 // math.gcd(W, 128)                 # == 1 when W % 128 == 0 (no packing)
    LW = Bc * W
    NCp = ((NC + Bc - 1) // Bc) * Bc             # pad channel count instead of losing density
    NCB = NCp // Bc

    # ---- Batch-group channel-blocks into big grid steps (budget sized for v7x). ----
    TARGET_IN_BLOCK = 2 << 20                    # bytes of input per grid step
    img_bytes = H * LW * itemsize
    Bg = _pick_bg(NCB, img_bytes, TARGET_IN_BLOCK)
    G = NCB // Bg
    # TODO(synk): images whose single-slab footprint exceeds the VMEM budget (very large
    # H*W) would need an H-split with a 1-row halo; not implemented.

    in_block = Bg * img_bytes
    out_block = n_phase * in_block
    slab_f32 = H * LW * 4
    footprint = 2 * in_block + 2 * out_block + 8 * slab_f32     # dbl-buffered bufs + live slabs
    vmem_limit = max(48 * 1024 * 1024, int(footprint * 1.2))

    # ---- Pack channels along lanes (XLA layout plumbing over the small input). ----
    xr = x.reshape(NC, H, W)
    if NCp != NC:
        xr = jnp.pad(xr, ((0, NCp - NC), (0, 0), (0, 0)))
    if Bc == 1:
        xp = xr                                   # free reshape, no transpose
    else:
        xp = xr.reshape(NCB, Bc, H, W).transpose(0, 2, 1, 3).reshape(NCB, H, LW)

    def fir_kernel(x_ref, o_ref):
        # Hoisted, coefficient-folded boundary masks (computed once per grid step,
        # reused for every image in the block and every tap).
        rows = lax.broadcasted_iota(jnp.int32, (H, 1), 0)
        cols = lax.broadcasted_iota(jnp.int32, (1, LW), 1) % W

        def row_mask(coef, d):
            ok = (rows + d >= 0) & (rows + d < H)
            return jnp.where(ok, coef, 0.0).astype(acc_dtype)

        def col_mask(coef, d):
            ok = (cols + d >= 0) & (cols + d < W)
            return jnp.where(ok, coef, 0.0).astype(acc_dtype)

        row_terms = [[(d, row_mask(c, d)) for (c, d) in prow] for prow in taps]
        col_terms = [[(d, col_mask(c, d)) for (c, d) in pcol] for pcol in taps]

        def body(bg, carry):
            img = x_ref[bg].astype(acc_dtype)                     # (H, LW)
            # One vertical-phase slab at a time; emit its horizontal phases immediately
            # (keeps live intermediates to ~3 slabs instead of 1 + up).
            for py in range(up):
                v = None
                for d, m in row_terms[py]:
                    t = (pltpu.roll(img, (-d) % H, axis=0) if d else img) * m
                    v = t if v is None else v + t
                for px in range(up):
                    h = None
                    for d, m in col_terms[px]:
                        t = (pltpu.roll(v, (-d) % LW, axis=1) if d else v) * m
                        h = t if h is None else h + t
                    o_ref[bg, py * up + px] = h.astype(o_ref.dtype)   # full-width (H, LW) vst
            return carry

        lax.fori_loop(0, Bg, body, 0)

    flops = 2 * (1 + up) * K * H * W * NC                          # separable polyphase MACs
    bytes_accessed = NC * H * W * itemsize + NC * out_h * out_w * itemsize

    out_p = pl.pallas_call(
        fir_kernel,
        out_shape=jax.ShapeDtypeStruct((NCB, n_phase, H, LW), x.dtype),
        grid=(G,),
        in_specs=[pl.BlockSpec((Bg, H, LW), lambda g: (g, 0, 0))],
        out_specs=pl.BlockSpec((Bg, n_phase, H, LW), lambda g: (g, 0, 0, 0)),
        compiler_params=pltpu.CompilerParams(
            dimension_semantics=("parallel",),
            vmem_limit_bytes=vmem_limit,
            allow_input_fusion=[0],
        ),
        cost_estimate=pl.CostEstimate(
            flops=flops, transcendentals=0, bytes_accessed=bytes_accessed),
    )(xp)

    # ---- Un-interleave phases & channels back to NCHW (wrapper-side XLA pass). ----
    # out_p dims: (block, py, px, m, c_in_block, n);  row = m*up+py, col = n*up+px.
    outr = (out_p.reshape(NCB, up, up, H, Bc, W)
                 .transpose(0, 4, 3, 1, 5, 2)
                 .reshape(NCp, out_h, out_w))
    if NCp != NC:
        outr = outr[:NC]
    return outr.reshape(N, C, out_h, out_w)


def upsample_ref(x, kernel_1d=(1, 3, 3, 1), factor=2):
    """Independent reference via lax.conv_general_dilated (depthwise, lhs-dilated)."""
    N, C, H, W = x.shape
    k2d = make_kernel(kernel_1d) * (factor ** 2)
    K = k2d.shape[0]
    p = K - factor
    pad0 = (p + 1) // 2 + factor - 1
    pad1 = p // 2
    kflip = jnp.asarray(np.ascontiguousarray(k2d[::-1, ::-1]), x.dtype)
    w = jnp.tile(kflip[None, None], (C, 1, 1, 1))  # (C, 1, K, K)
    # lhs_dilation inserts zeros *between* samples only; upfirdn also appends
    # (factor-1) trailing zero rows/cols -> add them to the high padding.
    return lax.conv_general_dilated(
        x, w, window_strides=(1, 1),
        padding=((pad0, pad1 + factor - 1), (pad0, pad1 + factor - 1)),
        lhs_dilation=(factor, factor), rhs_dilation=(1, 1),
        dimension_numbers=("NCHW", "OIHW", "NCHW"),
        feature_group_count=C)


if __name__ == "__main__":
    root = jax.random.PRNGKey(0)
    k0, k1, k2 = jax.random.split(root, 3)

    # Primary case from the module spec.
    x = jax.random.normal(k0, (2, 4, 16, 16), dtype=jnp.float32)
    out = jax.block_until_ready(upsample_pallas(x, kernel_1d=(1, 3, 3, 1), factor=2))
    ref = jax.block_until_ready(upsample_ref(x, kernel_1d=(1, 3, 3, 1), factor=2))
    assert out.shape == (2, 4, 32, 32), out.shape
    np.testing.assert_allclose(np.asarray(out), np.asarray(ref), rtol=1e-5, atol=1e-5)

    # Extra coverage: batch-grouped blocks with grid >= 2 (Bg=2, G=2).
    x2 = jax.random.normal(k1, (2, 16, 8, 16), dtype=jnp.float32)
    out2 = jax.block_until_ready(upsample_pallas(x2))
    np.testing.assert_allclose(np.asarray(out2), np.asarray(upsample_ref(x2)),
                               rtol=1e-5, atol=1e-5)

    # Extra coverage: channel-count padding path (NC not a multiple of Bc).
    x3 = jax.random.normal(k2, (1, 3, 8, 16), dtype=jnp.float32)
    out3 = jax.block_until_ready(upsample_pallas(x3))
    np.testing.assert_allclose(np.asarray(out3), np.asarray(upsample_ref(x3)),
                               rtol=1e-5, atol=1e-5)

    print("KERNEL_OK")
</pallas_src>

<mosaic_0001>
module attributes {stable_mosaic.version = 11 : i64} {
  func.func @fir_kernel(%arg0: i32, %arg1: memref<1x16x128xf32, #tpu.memory_space<vmem>>, %arg2: memref<1x4x16x128xf32, #tpu.memory_space<vmem>>) attributes {dimension_semantics = [#tpu.dimension_semantics<parallel>], iteration_bounds = array<i64: 1>, scalar_prefetch = 0 : i64, scratch_operands = 0 : i64, tpu.core_type = #tpu.core_type<tc>, window_params = [{transform_indices = @transform_0, window_bounds = array<i64: 1, 16, 128>}, {transform_indices = @transform_1, window_bounds = array<i64: 1, 4, 16, 128>}]} {
    %0 = tpu.iota {dimensions = array<i32: 0>} : vector<16x1xi32>
    %1 = tpu.iota {dimensions = array<i32: 1>} : vector<1x128xi32>
    %c16_i32 = arith.constant 16 : i32
    %c0_i32 = arith.constant 0 : i32
    %2 = arith.cmpi eq, %c16_i32, %c0_i32 : i32
    %c1_i32 = arith.constant 1 : i32
    %3 = arith.select %2, %c1_i32, %c16_i32 : i32
    %4 = vector.broadcast %3 : i32 to vector<1x128xi32>
    %5 = arith.remsi %1, %4 : vector<1x128xi32>
    %c0_i32_0 = arith.constant 0 : i32
    %6 = vector.broadcast %c0_i32_0 : i32 to vector<1x128xi32>
    %7 = arith.cmpi ne, %5, %6 : vector<1x128xi32>
    %c0_i32_1 = arith.constant 0 : i32
    %8 = vector.broadcast %c0_i32_1 : i32 to vector<1x128xi32>
    %9 = arith.cmpi slt, %5, %8 : vector<1x128xi32>
    %c0_i32_2 = arith.constant 0 : i32
    %10 = arith.cmpi slt, %3, %c0_i32_2 : i32
    %11 = vector.broadcast %10 : i1 to vector<1x128xi1>
    %12 = vector.broadcast %11 : vector<1x128xi1> to vector<1x128xi1>
    %13 = arith.xori %9, %12 : vector<1x128xi1>
    %14 = arith.andi %13, %7 : vector<1x128xi1>
    %15 = vector.broadcast %3 : i32 to vector<1x128xi32>
    %16 = arith.addi %5, %15 : vector<1x128xi32>
    %17 = arith.select %14, %16, %5 : vector<1x128xi1>, vector<1x128xi32>
    %c-1_i32 = arith.constant -1 : i32
    %18 = vector.broadcast %c-1_i32 : i32 to vector<16x1xi32>
    %19 = arith.addi %0, %18 : vector<16x1xi32>
    %c0_i32_3 = arith.constant 0 : i32
    %20 = vector.broadcast %c0_i32_3 : i32 to vector<16x1xi32>
    %21 = arith.cmpi sge, %19, %20 : vector<16x1xi32>
    %c-1_i32_4 = arith.constant -1 : i32
    %22 = vector.broadcast %c-1_i32_4 : i32 to vector<16x1xi32>
    %23 = arith.addi %0, %22 : vector<16x1xi32>
    %c16_i32_5 = arith.constant 16 : i32
    %24 = vector.broadcast %c16_i32_5 : i32 to vector<16x1xi32>
    %25 = arith.cmpi slt, %23, %24 : vector<16x1xi32>
    %26 = arith.andi %21, %25 : vector<16x1xi1>
    %cst = arith.constant 2.500000e-01 : f32
    %cst_6 = arith.constant 0.000000e+00 : f32
    %27 = vector.broadcast %cst : f32 to vector<16x1xf32>
    %28 = vector.broadcast %cst_6 : f32 to vector<16x1xf32>
    %29 = arith.select %26, %27, %28 : vector<16x1xi1>, vector<16x1xf32>
    %c0_i32_7 = arith.constant 0 : i32
    %30 = vector.broadcast %c0_i32_7 : i32 to vector<16x1xi32>
    %31 = arith.addi %0, %30 : vector<16x1xi32>
    %c0_i32_8 = arith.constant 0 : i32
    %32 = vector.broadcast %c0_i32_8 : i32 to vector<16x1xi32>
    %33 = arith.cmpi sge, %31, %32 : vector<16x1xi32>
    %c0_i32_9 = arith.constant 0 : i32
    %34 = vector.broadcast %c0_i32_9 : i32 to vector<16x1xi32>
    %35 = arith.addi %0, %34 : vector<16x1xi32>
    %c16_i32_10 = arith.constant 16 : i32
    %36 = vector.broadcast %c16_i32_10 : i32 to vector<16x1xi32>
    %37 = arith.cmpi slt, %35, %36 : vector<16x1xi32>
    %38 = arith.andi %33, %37 : vector<16x1xi1>
    %cst_11 = arith.constant 7.500000e-01 : f32
    %cst_12 = arith.constant 0.000000e+00 : f32
    %39 = vector.broadcast %cst_11 : f32 to vector<16x1xf32>
    %40 = vector.broadcast %cst_12 : f32 to vector<16x1xf32>
    %41 = arith.select %38, %39, %40 : vector<16x1xi1>, vector<16x1xf32>
    %c0_i32_13 = arith.constant 0 : i32
    %42 = vector.broadcast %c0_i32_13 : i32 to vector<16x1xi32>
    %43 = arith.addi %0, %42 : vector<16x1xi32>
    %c0_i32_14 = arith.constant 0 : i32
    %44 = vector.broadcast %c0_i32_14 : i32 to vector<16x1xi32>
    %45 = arith.cmpi sge, %43, %44 : vector<16x1xi32>
    %c0_i32_15 = arith.constant 0 : i32
    %46 = vector.broadcast %c0_i32_15 : i32 to vector<16x1xi32>
    %47 = arith.addi %0, %46 : vector<16x1xi32>
    %c16_i32_16 = arith.constant 16 : i32
    %48 = vector.broadcast %c16_i32_16 : i32 to vector<16x1xi32>
    %49 = arith.cmpi slt, %47, %48 : vector<16x1xi32>
    %50 = arith.andi %45, %49 : vector<16x1xi1>
    %cst_17 = arith.constant 7.500000e-01 : f32
    %cst_18 = arith.constant 0.000000e+00 : f32
    %51 = vector.broadcast %cst_17 : f32 to vector<16x1xf32>
    %52 = vector.broadcast %cst_18 : f32 to vector<16x1xf32>
    %53 = arith.select %50, %51, %52 : vector<16x1xi1>, vector<16x1xf32>
    %c1_i32_19 = arith.constant 1 : i32
    %54 = vector.broadcast %c1_i32_19 : i32 to vector<16x1xi32>
    %55 = arith.addi %0, %54 : vector<16x1xi32>
    %c0_i32_20 = arith.constant 0 : i32
    %56 = vector.broadcast %c0_i32_20 : i32 to vector<16x1xi32>
    %57 = arith.cmpi sge, %55, %56 : vector<16x1xi32>
    %c1_i32_21 = arith.constant 1 : i32
    %58 = vector.broadcast %c1_i32_21 : i32 to vector<16x1xi32>
    %59 = arith.addi %0, %58 : vector<16x1xi32>
    %c16_i32_22 = arith.constant 16 : i32
    %60 = vector.broadcast %c16_i32_22 : i32 to vector<16x1xi32>
    %61 = arith.cmpi slt, %59, %60 : vector<16x1xi32>
    %62 = arith.andi %57, %61 : vector<16x1xi1>
    %cst_23 = arith.constant 2.500000e-01 : f32
    %cst_24 = arith.constant 0.000000e+00 : f32
    %63 = vector.broadcast %cst_23 : f32 to vector<16x1xf32>
    %64 = vector.broadcast %cst_24 : f32 to vector<16x1xf32>
    %65 = arith.select %62, %63, %64 : vector<16x1xi1>, vector<16x1xf32>
    %c-1_i32_25 = arith.constant -1 : i32
    %66 = vector.broadcast %c-1_i32_25 : i32 to vector<1x128xi32>
    %67 = arith.addi %17, %66 : vector<1x128xi32>
    %c0_i32_26 = arith.constant 0 : i32
    %68 = vector.broadcast %c0_i32_26 : i32 to vector<1x128xi32>
    %69 = arith.cmpi sge, %67, %68 : vector<1x128xi32>
    %c-1_i32_27 = arith.constant -1 : i32
    %70 = vector.broadcast %c-1_i32_27 : i32 to vector<1x128xi32>
    %71 = arith.addi %17, %70 : vector<1x128xi32>
    %c16_i32_28 = arith.constant 16 : i32
    %72 = vector.broadcast %c16_i32_28 : i32 to vector<1x128xi32>
    %73 = arith.cmpi slt, %71, %72 : vector<1x128xi32>
    %74 = arith.andi %69, %73 : vector<1x128xi1>
    %cst_29 = arith.constant 2.500000e-01 : f32
    %cst_30 = arith.constant 0.000000e+00 : f32
    %75 = vector.broadcast %cst_29 : f32 to vector<1x128xf32>
    %76 = vector.broadcast %cst_30 : f32 to vector<1x128xf32>
    %77 = arith.select %74, %75, %76 : vector<1x128xi1>, vector<1x128xf32>
    %c0_i32_31 = arith.constant 0 : i32
    %78 = vector.broadcast %c0_i32_31 : i32 to vector<1x128xi32>
    %79 = arith.addi %17, %78 : vector<1x128xi32>
    %c0_i32_32 = arith.constant 0 : i32
    %80 = vector.broadcast %c0_i32_32 : i32 to vector<1x128xi32>
    %81 = arith.cmpi sge, %79, %80 : vector<1x128xi32>
    %c0_i32_33 = arith.constant 0 : i32
    %82 = vector.broadcast %c0_i32_33 : i32 to vector<1x128xi32>
    %83 = arith.addi %17, %82 : vector<1x128xi32>
    %c16_i32_34 = arith.constant 16 : i32
    %84 = vector.broadcast %c16_i32_34 : i32 to vector<1x128xi32>
    %85 = arith.cmpi slt, %83, %84 : vector<1x128xi32>
    %86 = arith.andi %81, %85 : vector<1x128xi1>
    %cst_35 = arith.constant 7.500000e-01 : f32
    %cst_36 = arith.constant 0.000000e+00 : f32
    %87 = vector.broadcast %cst_35 : f32 to vector<1x128xf32>
    %88 = vector.broadcast %cst_36 : f32 to vector<1x128xf32>
    %89 = arith.select %86, %87, %88 : vector<1x128xi1>, vector<1x128xf32>
    %c0_i32_37 = arith.constant 0 : i32
    %90 = vector.broadcast %c0_i32_37 : i32 to vector<1x128xi32>
    %91 = arith.addi %17, %90 : vector<1x128xi32>
    %c0_i32_38 = arith.constant 0 : i32
    %92 = vector.broadcast %c0_i32_38 : i32 to vector<1x128xi32>
    %93 = arith.cmpi sge, %91, %92 : vector<1x128xi32>
    %c0_i32_39 = arith.constant 0 : i32
    %94 = vector.broadcast %c0_i32_39 : i32 to vector<1x128xi32>
    %95 = arith.addi %17, %94 : vector<1x128xi32>
    %c16_i32_40 = arith.constant 16 : i32
    %96 = vector.broadcast %c16_i32_40 : i32 to vector<1x128xi32>
    %97 = arith.cmpi slt, %95, %96 : vector<1x128xi32>
    %98 = arith.andi %93, %97 : vector<1x128xi1>
    %cst_41 = arith.constant 7.500000e-01 : f32
    %cst_42 = arith.constant 0.000000e+00 : f32
    %99 = vector.broadcast %cst_41 : f32 to vector<1x128xf32>
    %100 = vector.broadcast %cst_42 : f32 to vector<1x128xf32>
    %101 = arith.select %98, %99, %100 : vector<1x128xi1>, vector<1x128xf32>
    %c1_i32_43 = arith.constant 1 : i32
    %102 = vector.broadcast %c1_i32_43 : i32 to vector<1x128xi32>
    %103 = arith.addi %17, %102 : vector<1x128xi32>
    %c0_i32_44 = arith.constant 0 : i32
    %104 = vector.broadcast %c0_i32_44 : i32 to vector<1x128xi32>
    %105 = arith.cmpi sge, %103, %104 : vector<1x128xi32>
    %c1_i32_45 = arith.constant 1 : i32
    %106 = vector.broadcast %c1_i32_45 : i32 to vector<1x128xi32>
    %107 = arith.addi %17, %106 : vector<1x128xi32>
    %c16_i32_46 = arith.constant 16 : i32
    %108 = vector.broadcast %c16_i32_46 : i32 to vector<1x128xi32>
    %109 = arith.cmpi slt, %107, %108 : vector<1x128xi32>
    %110 = arith.andi %105, %109 : vector<1x128xi1>
    %cst_47 = arith.constant 2.500000e-01 : f32
    %cst_48 = arith.constant 0.000000e+00 : f32
    %111 = vector.broadcast %cst_47 : f32 to vector<1x128xf32>
    %112 = vector.broadcast %cst_48 : f32 to vector<1x128xf32>
    %113 = arith.select %110, %111, %112 : vector<1x128xi1>, vector<1x128xf32>
    %c0_i32_49 = arith.constant 0 : i32
    %114 = arith.index_cast %c0_i32_49 : i32 to index
    %c0 = arith.constant 0 : index
    %c0_50 = arith.constant 0 : index
    %115 = vector.load %arg1[%114, %c0, %c0_50] : memref<1x16x128xf32, #tpu.memory_space<vmem>>, vector<1x16x128xf32>
    %116 = vector.shape_cast %115 : vector<1x16x128xf32> to vector<16x128xf32>
    %c1_i32_51 = arith.constant 1 : i32
    %117 = tpu.dynamic_rotate %116 by %c1_i32_51 dim 0 : vector<16x128xf32>, i32 -> vector<16x128xf32>
    %118 = vector.broadcast %29 : vector<16x1xf32> to vector<16x128xf32>
    %119 = arith.mulf %117, %118 : vector<16x128xf32>
    %120 = vector.broadcast %41 : vector<16x1xf32> to vector<16x128xf32>
    %121 = arith.mulf %116, %120 : vector<16x128xf32>
    %122 = arith.addf %119, %121 : vector<16x128xf32>
    %c1_i32_52 = arith.constant 1 : i32
    %123 = tpu.dynamic_rotate %122 by %c1_i32_52 dim 1 : vector<16x128xf32>, i32 -> vector<16x128xf32>
    %124 = vector.broadcast %77 : vector<1x128xf32> to vector<16x128xf32>
    %125 = arith.mulf %123, %124 : vector<16x128xf32>
    %126 = vector.broadcast %89 : vector<1x128xf32> to vector<16x128xf32>
    %127 = arith.mulf %122, %126 : vector<16x128xf32>
    %128 = arith.addf %125, %127 : vector<16x128xf32>
    %129 = arith.index_cast %c0_i32_49 : i32 to index
    %c0_53 = arith.constant 0 : index
    %c0_54 = arith.constant 0 : index
    %c0_55 = arith.constant 0 : index
    %130 = vector.load %arg2[%129, %c0_53, %c0_54, %c0_55] : memref<1x4x16x128xf32, #tpu.memory_space<vmem>>, vector<1x1x16x128xf32>
    %131 = vector.shape_cast %130 : vector<1x1x16x128xf32> to vector<16x128xf32>
    %132 = vector.shape_cast %128 : vector<16x128xf32> to vector<1x1x16x128xf32>
    tpu.vector_store %arg2[%129, %c0_53, %c0_54, %c0_55], %132 {strides = array<i32>} : memref<1x4x16x128xf32, #tpu.memory_space<vmem>>, vector<1x1x16x128xf32>,
    %133 = vector.broadcast %101 : vector<1x128xf32> to vector<16x128xf32>
    %134 = arith.mulf %122, %133 : vector<16x128xf32>
    %c127_i32 = arith.constant 127 : i32
    %135 = tpu.dynamic_rotate %122 by %c127_i32 dim 1 : vector<16x128xf32>, i32 -> vector<16x128xf32>
    %136 = vector.broadcast %113 : vector<1x128xf32> to vector<16x128xf32>
    %137 = arith.mulf %135, %136 : vector<16x128xf32>
    %138 = arith.addf %134, %137 : vector<16x128xf32>
    %139 = arith.index_cast %c0_i32_49 : i32 to index
    %c1 = arith.constant 1 : index
    %c0_56 = arith.constant 0 : index
    %c0_57 = arith.constant 0 : index
    %140 = vector.load %arg2[%139, %c1, %c0_56, %c0_57] : memref<1x4x16x128xf32, #tpu.memory_space<vmem>>, vector<1x1x16x128xf32>
    %141 = vector.shape_cast %140 : vector<1x1x16x128xf32> to vector<16x128xf32>
    %142 = vector.shape_cast %138 : vector<16x128xf32> to vector<1x1x16x128xf32>
    tpu.vector_store %arg2[%139, %c1, %c0_56, %c0_57], %142 {strides = array<i32>} : memref<1x4x16x128xf32, #tpu.memory_space<vmem>>, vector<1x1x16x128xf32>,
    %143 = vector.broadcast %53 : vector<16x1xf32> to vector<16x128xf32>
    %144 = arith.mulf %116, %143 : vector<16x128xf32>
    %c15_i32 = arith.constant 15 : i32
    %145 = tpu.dynamic_rotate %116 by %c15_i32 dim 0 : vector<16x128xf32>, i32 -> vector<16x128xf32>
    %146 = vector.broadcast %65 : vector<16x1xf32> to vector<16x128xf32>
    %147 = arith.mulf %145, %146 : vector<16x128xf32>
    %148 = arith.addf %144, %147 : vector<16x128xf32>
    %c1_i32_58 = arith.constant 1 : i32
    %149 = tpu.dynamic_rotate %148 by %c1_i32_58 dim 1 : vector<16x128xf32>, i32 -> vector<16x128xf32>
    %150 = vector.broadcast %77 : vector<1x128xf32> to vector<16x128xf32>
    %151 = arith.mulf %149, %150 : vector<16x128xf32>
    %152 = vector.broadcast %89 : vector<1x128xf32> to vector<16x128xf32>
    %153 = arith.mulf %148, %152 : vector<16x128xf32>
    %154 = arith.addf %151, %153 : vector<16x128xf32>
    %155 = arith.index_cast %c0_i32_49 : i32 to index
    %c2 = arith.constant 2 : index
    %c0_59 = arith.constant 0 : index
    %c0_60 = arith.constant 0 : index
    %156 = vector.load %arg2[%155, %c2, %c0_59, %c0_60] : memref<1x4x16x128xf32, #tpu.memory_space<vmem>>, vector<1x1x16x128xf32>
    %157 = vector.shape_cast %156 : vector<1x1x16x128xf32> to vector<16x128xf32>
    %158 = vector.shape_cast %154 : vector<16x128xf32> to vector<1x1x16x128xf32>
    tpu.vector_store %arg2[%155, %c2, %c0_59, %c0_60], %158 {strides = array<i32>} : memref<1x4x16x128xf32, #tpu.memory_space<vmem>>, vector<1x1x16x128xf32>,
    %159 = vector.broadcast %101 : vector<1x128xf32> to vector<16x128xf32>
    %160 = arith.mulf %148, %159 : vector<16x128xf32>
    %c127_i32_61 = arith.constant 127 : i32
    %161 = tpu.dynamic_rotate %148 by %c127_i32_61 dim 1 : vector<16x128xf32>, i32 -> vector<16x128xf32>
    %162 = vector.broadcast %113 : vector<1x128xf32> to vector<16x128xf32>
    %163 = arith.mulf %161, %162 : vector<16x128xf32>
    %164 = arith.addf %160, %163 : vector<16x128xf32>
    %165 = arith.index_cast %c0_i32_49 : i32 to index
    %c3 = arith.constant 3 : index
    %c0_62 = arith.constant 0 : index
    %c0_63 = arith.constant 0 : index
    %166 = vector.load %arg2[%165, %c3, %c0_62, %c0_63] : memref<1x4x16x128xf32, #tpu.memory_space<vmem>>, vector<1x1x16x128xf32>
    %167 = vector.shape_cast %166 : vector<1x1x16x128xf32> to vector<16x128xf32>
    %168 = vector.shape_cast %164 : vector<16x128xf32> to vector<1x1x16x128xf32>
    tpu.vector_store %arg2[%165, %c3, %c0_62, %c0_63], %168 {strides = array<i32>} : memref<1x4x16x128xf32, #tpu.memory_space<vmem>>, vector<1x1x16x128xf32>,
    %c1_i32_64 = arith.constant 1 : i32
    return
  }
  func.func @transform_0(%arg0: i32) -> (i32, i32, i32) {
    %c0_i32 = arith.constant 0 : i32
    %c0_i32_0 = arith.constant 0 : i32
    %c0_i32_1 = arith.constant 0 : i32
    return %arg0, %c0_i32, %c0_i32_0 : i32, i32, i32
  }
  func.func @transform_1(%arg0: i32) -> (i32, i32, i32, i32) {
    %c0_i32 = arith.constant 0 : i32
    %c0_i32_0 = arith.constant 0 : i32
    %c0_i32_1 = arith.constant 0 : i32
    %c0_i32_2 = arith.constant 0 : i32
    return %arg0, %c0_i32, %c0_i32_0, %c0_i32_1 : i32, i32, i32, i32
  }
}

</mosaic_0001>

<bundles_post_ra>
// kernel: tpu_custom_call.1
= control target key start
LH: loop header
LB: loop body
LE: loop exit
PB: predicated region body
PF: predicated region fallthrough
CT: control target
= control target key end

     0   :  { %6 = vsyncpa [#allocation3], 0  ;;  %s272_s0 = inlined_call_operand.hbm [shape: f32[1,16,128], index: 0, kind: input, shape index: {}]   ;;  %s273_s1 = inlined_call_operand.hbm [shape: f32[1,4,16,128], index: 1, kind: output, shape index: {}]  }
   0x1   :  { %7 = vsyncpa [#allocation4], 0  ;;  %s223_s6 = smov [#allocation2]   ;;  %s175_s10 = scalar_lea.hbm %s272_s0, 256 }
   0x2   :  { %s13_s7 = sshll.u32 %s223_s6, 4  ;;  %p176_p0 = scmp.ne.s32.totalorder %s272_s0, %s175_s10  ;;  %s14_s7 = int_to_ptr.vmem [resolvable:$true] %s13_s7 }
   0x3   :  { %p179_p1 = scmp.lt.u32.totalorder %s175_s10, %s272_s0 }
   0x5   :  { %p181_p2 = pnand %p179_p1, %p176_p0 }
   0x7   :  { %184 = shalt.err (!%p181_p2)
}
   0x8   :  { %s185_s15 = scalar_lea.vmem %s14_s7, 256  ;;  %p190_p4 = scmp.lt.s32.totalorder %s14_s7, %s14_s7 }
   0x9   :  { %p186_p3 = scmp.ne.s32.totalorder %s14_s7, %s185_s15  ;;  %p191_p5 = scmp.lt.s32.totalorder %s185_s15, %s185_s15 }
   0xb   :  { %p192_p6 = por %p191_p5, %p190_p4 }
   0xd   :  { %p193_p7 = pnand %p192_p6, %p186_p3 }
   0xf   :  { %196 = shalt.err (!%p193_p7)
}
  0x10   :  { %s224_s16 = smov 128   ;;  %s225_s17 = smov 8  }
  0x11   :  { %19 = dma.hbm_to_vmem [thread:$0]  %s272_s0, 256, %s14_s7, [#allocation3], %s224_s16, %s224_s16, %s225_s17  }
  0x12   :  { %219 = dma.done.wait [#allocation3], 256  }
  0x13   :  { %220 = vsyncadd [#allocation3], 4294967040  ;;  %v23_v0 = vlaneseq  ;;  %v226_v7 = vmov 0.0   ;;  %v82_v9 = vld [vmem:[#allocation2] sm:$0xff]  ;;  %v83_v10 = vld [vmem:[#allocation2 + $0x8] sm:$0xff]  ;;  %s227_s0 = smov 127  }
  0x14   :  { %v84_v12 = vrot.slane %v82_v9, 7  ;;  %v85_v13 = vrot.slane %v83_v10, 7  ;;  %v118_v14 = vrot.slane %v82_v9, 1  ;;  %v91_v16 = vmul.f32 0.75, %v82_v9  ;;  %s228_s20 = smov 1   ;;  %s229_s21 = smov [#allocation5]  }
  0x15   :  { %v24_v1 = vshrl.u32 %v23_v0, 7  ;;  %v27_v2 = vand.u32 127, %v23_v0  ;;  %v119_v17 = vrot.slane %v83_v10, 1  ;;  %v92_v23 = vmul.f32 0.75, %v83_v10  ;;  %s156_s22 = sshll.u32 %s229_s21, 4  ;;  %s157_s22 = int_to_ptr.vmem [resolvable:$true] %s156_s22 }
  0x16   :  { %s197_s23 = scalar_lea.vmem %s157_s22, 1024  ;;  %p202_p9 = scmp.lt.s32.totalorder %s157_s22, %s157_s22 }
  0x17   :  { %v40_v3 = vadd.s32 4294967295, %v24_v1  ;;  %v25_v4 = vadd.s32 8, %v24_v1  ;;  %v32_v5 = vand.u32 15, %v27_v2  ;;  %vm86_vm1 = vcmp.lt.s32.totalorder %v24_v1, 1  ;;  %p198_p8 = scmp.ne.s32.totalorder %s157_s22, %s197_s23  ;;  %p203_p10 = scmp.lt.s32.totalorder %s197_s23, %s197_s23 }
  0x18   :  { %vm120_vm2 = vcmp.lt.s32.totalorder %v24_v1, 7  ;;  %v88_v18 = vsel %vm86_vm1, %v85_v13, %v84_v12  ;;  %v87_v19 = vsel %vm86_vm1, %v84_v12, %v85_v13 }
  0x19   :  { %vm42_vm0 = vcmp.ge.s32.totalorder %v40_v3, 0  ;;  %v59_v6 = vadd.s32 1, %v25_v4  ;;  %v77_v11 = vadd.s32 1, %v32_v5  ;;  %v68_v15 = vadd.s32 4294967295, %v32_v5  ;;  %p204_p11 = por %p203_p10, %p202_p9 }
  0x1a   :  { %v48_v8 = vsel %vm42_vm0, 0.25, %v226_v7  ;;  %v90_v22 = vmul.f32 0.25, %v87_v19  ;;  %v122_v25 = vsel %vm120_vm2, %v119_v17, %v118_v14  ;;  %v121_v26 = vsel %vm120_vm2, %v118_v14, %v119_v17 }
  0x1b   :  { %vm63_vm3 = vcmp.lt.s32.totalorder %v59_v6, 16  ;;  %vm79_vm4 = vcmp.lt.s32.totalorder %v77_v11, 16  ;;  %v89_v21 = vmul.f32 %v88_v18, %v48_v8  ;;  %vm69_vm5 = vcmp.ge.s32.totalorder %v68_v15, 0  ;;  %p205_p12 = pnand %p204_p11, %p198_p8 }
  0x1c   :  { %v81_v20 = vsel %vm79_vm4, 0.25, %v226_v7  ;;  %v67_v24 = vsel %vm63_vm3, 0.25, %v226_v7  ;;  %v72_v28 = vsel %vm69_vm5, 0.25, %v226_v7  ;;  %v94_v29 = vadd.f32 %v92_v23, %v90_v22 }
  0x1d   :  { %v93_v27 = vadd.f32 %v91_v16, %v89_v21  ;;  %v124_v30 = vmul.f32 %v122_v25, %v67_v24  ;;  %v123_v31 = vmul.f32 0.25, %v121_v26 }
  0x1e   :  { %v102_v41 = vmul.f32 0.75, %v94_v29 }
  0x1f   :  { %107 = vrot.lane.b32.xlu1 %v93_v27, %s227_s0  ;;  %95 = vrot.lane.b32.xlu0 %v93_v27, %s228_s20  ;;  %v126_v32 = vadd.f32 %v124_v30, %v92_v23  ;;  %v125_v33 = vadd.f32 %v123_v31, %v91_v16  ;;  %v101_v34 = vmul.f32 0.75, %v93_v27 }
  0x21   :  { %v134_v48 = vmul.f32 0.75, %v126_v32  ;;  %v133_v49 = vmul.f32 0.75, %v125_v33 }
  0x23   :  { %109 = vrot.lane.b32.xlu1 %v94_v29, %s227_s0  ;;  %97 = vrot.lane.b32.xlu0 %v94_v29, %s228_s20 }
  0x27   :  { %129 = vrot.lane.b32.xlu1 %v126_v32, %s228_s20  ;;  %127 = vrot.lane.b32.xlu0 %v125_v33, %s228_s20 }
  0x2b   :  { %142 = vrot.lane.b32.xlu1 %v126_v32, %s227_s0  ;;  %140 = vrot.lane.b32.xlu0 %v125_v33, %s227_s0 }
  0x91   :  { %v108_v35 = vpop.permute.xlu1 %107  ;;  %v96_v36 = vpop.permute.xlu0 %95 }
  0x92   :  { %v111_v37 = vmul.f32 %v108_v35, %v81_v20  ;;  %v99_v38 = vmul.f32 %v96_v36, %v72_v28 }
  0x94   :  { %v113_v39 = vadd.f32 %v111_v37, %v101_v34  ;;  %v103_v40 = vadd.f32 %v101_v34, %v99_v38 }
  0x95   :  { %v110_v42 = vpop.permute.xlu1 %109  ;;  %v98_v43 = vpop.permute.xlu0 %97 }
  0x96   :  { %116 = vst [vmem:[#allocation5 + $0x10] sm:$0xff] %v113_v39  ;;  %105 = vst [vmem:[#allocation5] sm:$0xff] %v103_v40  ;;  %v112_v44 = vmul.f32 %v110_v42, %v81_v20  ;;  %v100_v45 = vmul.f32 %v98_v43, %v72_v28 }
  0x98   :  { %v114_v46 = vadd.f32 %v112_v44, %v102_v41  ;;  %v104_v47 = vadd.f32 %v102_v41, %v100_v45 }
  0x99   :  { %v130_v50 = vpop.permute.xlu1 %129  ;;  %v128_v51 = vpop.permute.xlu0 %127 }
  0x9a   :  { %117 = vst [vmem:[#allocation5 + $0x18] sm:$0xff] %v114_v46  ;;  %106 = vst [vmem:[#allocation5 + $0x8] sm:$0xff] %v104_v47  ;;  %v132_v52 = vmul.f32 %v130_v50, %v72_v28  ;;  %v131_v53 = vmul.f32 %v128_v51, %v72_v28 }
  0x9c   :  { %v136_v54 = vadd.f32 %v134_v48, %v132_v52  ;;  %v135_v55 = vadd.f32 %v133_v49, %v131_v53 }
  0x9d   :  { %v143_v56 = vpop.permute.xlu1 %142  ;;  %v141_v57 = vpop.permute.xlu0 %140 }
  0x9e   :  { %139 = vst [vmem:[#allocation5 + $0x28] sm:$0xff] %v136_v54  ;;  %138 = vst [vmem:[#allocation5 + $0x20] sm:$0xff] %v135_v55  ;;  %v145_v58 = vmul.f32 %v143_v56, %v81_v20  ;;  %v144_v59 = vmul.f32 %v141_v57, %v81_v20 }
  0xa0   :  { %v147_v60 = vadd.f32 %v145_v58, %v134_v48  ;;  %v146_v61 = vadd.f32 %v144_v59, %v133_v49 }
  0xa2   :  { %150 = vst [vmem:[#allocation5 + $0x38] sm:$0xff] %v147_v60  ;;  %149 = vst [vmem:[#allocation5 + $0x30] sm:$0xff] %v146_v61 }
  0xa3   :  { %208 = shalt.err (!%p205_p12)
}
  0xa4   :  { %s209_s26 = scalar_lea.hbm %s273_s1, 1024 }
  0xa5   :  { %p210_p13 = scmp.ne.s32.totalorder %s273_s1, %s209_s26  ;;  %p213_p0 = scmp.lt.u32.totalorder %s209_s26, %s273_s1 }
  0xa7   :  { %p215_p1 = pnand %p213_p0, %p210_p13 }
  0xa9   :  { %218 = shalt.err (!%p215_p1)
}
  0xaa   :  { %162 = dma.vmem_to_hbm [thread:$0]  %s157_s22, 1024, %s273_s1, [#allocation4], %s224_s16, %s224_s16, %s225_s17  }
  0xab   :  { %221 = dma.done.wait [#allocation4], 1024  }
  0xac   :  { %222 = vsyncadd [#allocation4], 4294966272 }
  0xad   :  { %166 = vsyncpa [#allocation3], 1 }
  0xae   :  { %167 = vsyncpa [#allocation4], 1 }

</bundles_post_ra>
